<compile_context>
chip_gen: v7x
topology: tpu7x:2x2x1
jax: 0.10.0
libtpu: 0.0.40
codegen_flags: <defaults>
</compile_context>

<pallas_src>
import jax
import jax.numpy as jnp
from jax.experimental import pallas as pl
from jax.experimental.pallas import tpu as pltpu

EPS = 1e-5
LANE = 128
NEG_INF = -1e30  # bias for padded logit lanes so log_softmax ignores them


def _round_up(n, m):
    return ((n + m - 1) // m) * m


# ----------------------------- kernel ---------------------------------------
def _base_model_kernel(x_ref, w1_ref, b1_ref, w2_ref, b2_ref, w3_ref, b3_ref,
                       o_ref):
    # ---- lin1: Linear -> ReLU -> BatchNorm1d (batch stats; affine folded) ----
    # x / w1 are bf16; MXU accumulates in f32.
    h = jnp.dot(x_ref[...], w1_ref[...], preferred_element_type=jnp.float32)
    h = jnp.maximum(h + b1_ref[...], 0.0)
    mean = jnp.mean(h, axis=0, keepdims=True)
    var = jnp.mean(jnp.square(h - mean), axis=0, keepdims=True)  # biased var
    h = (h - mean) * jax.lax.rsqrt(var + EPS)

    # ---- lin2: Linear (gamma1/beta1 pre-folded) -> ReLU -> BatchNorm1d ----
    h = jnp.dot(h, w2_ref[...], preferred_element_type=jnp.float32)
    h = jnp.maximum(h + b2_ref[...], 0.0)
    mean = jnp.mean(h, axis=0, keepdims=True)
    var = jnp.mean(jnp.square(h - mean), axis=0, keepdims=True)
    h = (h - mean) * jax.lax.rsqrt(var + EPS)

    # ---- lin3 (gamma2/beta2 pre-folded) + log_softmax(dim=1) ----
    # Padded logit lanes carry a -1e30 bias -> exp() == 0, never the max.
    logits = jnp.dot(h, w3_ref[...], preferred_element_type=jnp.float32) + b3_ref[...]
    m = jnp.max(logits, axis=1, keepdims=True)
    z = logits - m
    lse = jnp.log(jnp.sum(jnp.exp(z), axis=1, keepdims=True))
    o_ref[...] = (z - lse).astype(o_ref.dtype)


# ----------------------------- wrapper ---------------------------------------
def _fold_and_pad_params(params, matmul_dtype=jnp.bfloat16):
    """Fold BN affine params into the next linear layer and pad lane dims to 128."""
    (w1, b1, g1, be1, w2, b2, g2, be2, w3, b3) = params
    K, H = w1.shape
    O = w3.shape[1]

    # (n * g + be) @ W + b  ==  n @ (diag(g) @ W) + (be @ W + b)
    w2f = g1.reshape(H, 1) * w2
    b2f = b2 + be1 @ w2
    w3f = g2.reshape(H, 1) * w3
    b3f = b3 + be2 @ w3

    Kp = _round_up(K, LANE)
    Hp = _round_up(H, LANE)
    Op = _round_up(O, LANE)

    def pad2(a, rows, cols):
        return jnp.pad(a, ((0, rows - a.shape[0]), (0, cols - a.shape[1])))

    w1p = pad2(w1, Kp, Hp).astype(matmul_dtype)       # dominant DMA -> bf16
    b1p = pad2(b1, 1, Hp)
    w2p = pad2(w2f, Hp, Hp)
    b2p = pad2(b2f, 1, Hp)
    w3p = pad2(w3f, Hp, Op)
    b3p = jnp.concatenate(
        [b3f, jnp.full((1, Op - O), NEG_INF, b3f.dtype)], axis=1)
    return (w1p, b1p, w2p, b2p, w3p, b3p), (K, Kp, Hp, O, Op)


def base_model_forward(x_nchw, params):
    """x_nchw: (B, C, H, W) float32. Returns (B, num_outputs) log-probabilities."""
    B = x_nchw.shape[0]
    x2d = x_nchw.reshape(B, -1)  # == torch x.view(B, -1)

    (w1p, b1p, w2p, b2p, w3p, b3p), (K, Kp, Hp, O, Op) = _fold_and_pad_params(params)

    # Pad the flattened feature dim (zeros contribute nothing) and cast the
    # activations to bf16 to hit the MXU's native bf16 path.
    xp = jnp.pad(x2d, ((0, 0), (0, Kp - K))).astype(jnp.bfloat16)

    inputs = (xp, w1p, b1p, w2p, b2p, w3p, b3p)
    in_bytes = sum(int(a.size) * a.dtype.itemsize for a in inputs)
    out_bytes = B * Op * 4
    flops = 2 * B * (Kp * Hp + Hp * Hp + Hp * Op)
    cost = pl.CostEstimate(
        flops=flops,
        bytes_accessed=in_bytes + out_bytes,
        transcendentals=B * (Op + 4),  # exp per logit lane + rsqrt/log per row
    )

    # Everything is resident in VMEM (<1 MiB at these shapes); make the budget
    # explicit with generous headroom for intermediates / internal scratch.
    # TODO(synk): if num_inputs or B is scaled up (e.g. real images), switch to
    # a K-tiled grid with BlockSpec pipelining + accumulator scratch, especially
    # on v7x (64 MiB physical VMEM).
    vmem_bytes = max(4 * (in_bytes + out_bytes) + (2 << 20), 8 << 20)

    vmem = pl.BlockSpec(memory_space=pltpu.MemorySpace.VMEM)
    out_p = pl.pallas_call(
        _base_model_kernel,
        out_shape=jax.ShapeDtypeStruct((B, Op), jnp.float32),
        in_specs=[vmem] * len(inputs),
        out_specs=vmem,
        cost_estimate=cost,
        compiler_params=pltpu.CompilerParams(vmem_limit_bytes=int(vmem_bytes)),
    )(*inputs)

    return out_p[:, :O]  # slice padded logits back to the real classes


# --------------------------- reference & params -------------------------------
def base_model_reference(x_nchw, params):
    """Pure-JAX f32 reference (PyTorch training-mode forward)."""
    (w1, b1, g1, be1, w2, b2, g2, be2, w3, b3) = params
    B = x_nchw.shape[0]
    h = x_nchw.reshape(B, -1)

    def block(h, w, b, g, be):
        h = jnp.maximum(h @ w + b, 0.0)
        mean = jnp.mean(h, axis=0, keepdims=True)
        var = jnp.mean((h - mean) ** 2, axis=0, keepdims=True)
        return (h - mean) * jax.lax.rsqrt(var + EPS) * g + be

    h = block(h, w1, b1, g1, be1)
    h = block(h, w2, b2, g2, be2)
    logits = h @ w3 + b3
    return jax.nn.log_softmax(logits, axis=1)


def make_params(key, num_inputs, num_hidden, num_outputs):
    """Deterministic synthetic parameters (PyTorch-like uniform fan-in init)."""
    ks = jax.random.split(key, 10)

    def lin_init(kw, kb, fan_in, fan_out):
        bound = 1.0 / jnp.sqrt(fan_in)
        w = jax.random.uniform(kw, (fan_in, fan_out), jnp.float32, -bound, bound)
        b = jax.random.uniform(kb, (1, fan_out), jnp.float32, -bound, bound)
        return w, b

    w1, b1 = lin_init(ks[0], ks[1], num_inputs, num_hidden)
    w2, b2 = lin_init(ks[2], ks[3], num_hidden, num_hidden)
    w3, b3 = lin_init(ks[4], ks[5], num_hidden, num_outputs)

    # BN affine params: PyTorch inits to gamma=1, beta=0; perturb slightly here
    # so the gamma/beta folding path is actually exercised.
    g1 = 1.0 + 0.1 * jax.random.uniform(ks[6], (1, num_hidden), jnp.float32, -1, 1)
    be1 = 0.1 * jax.random.normal(ks[7], (1, num_hidden), jnp.float32)
    g2 = 1.0 + 0.1 * jax.random.uniform(ks[8], (1, num_hidden), jnp.float32, -1, 1)
    be2 = 0.1 * jax.random.normal(ks[9], (1, num_hidden), jnp.float32)

    return (w1, b1, g1, be1, w2, b2, g2, be2, w3, b3)


if __name__ == "__main__":
    key = jax.random.PRNGKey(0)
    k_x, k_p = jax.random.split(key)

    # Small shapes consistent with the module: Flatten(NCHW) -> num_inputs = C*H*W
    B, C, H, W = 8, 4, 16, 16
    num_inputs = C * H * W          # 1024
    num_hidden = 32
    num_outputs = 10

    x = jax.random.normal(k_x, (B, C, H, W), jnp.float32)
    params = make_params(k_p, num_inputs, num_hidden, num_outputs)

    out = base_model_forward(x, params)
    out = jax.block_until_ready(out)

    assert out.shape == (B, num_outputs)

    # log_softmax rows must sum to ~1 in probability space
    row_sums = jnp.sum(jnp.exp(out), axis=1)
    assert bool(jnp.all(jnp.abs(row_sums - 1.0) < 1e-4))

    # Match the pure-f32 reference (bf16 x/w1 introduces small rounding error).
    ref = base_model_reference(x, params)
    assert bool(jnp.all(jnp.abs(out - ref) < 0.15)), float(jnp.max(jnp.abs(out - ref)))

    print("KERNEL_OK")
</pallas_src>

<mosaic_0001>
module attributes {stable_mosaic.version = 11 : i64} {
  func.func @_base_model_kernel(%arg0: memref<8x1024xbf16, #tpu.memory_space<vmem>>, %arg1: memref<1024x128xbf16, #tpu.memory_space<vmem>>, %arg2: memref<1x128xf32, #tpu.memory_space<vmem>>, %arg3: memref<128x128xf32, #tpu.memory_space<vmem>>, %arg4: memref<1x128xf32, #tpu.memory_space<vmem>>, %arg5: memref<128x128xf32, #tpu.memory_space<vmem>>, %arg6: memref<1x128xf32, #tpu.memory_space<vmem>>, %arg7: memref<8x128xf32, #tpu.memory_space<vmem>>) attributes {dimension_semantics = [], scalar_prefetch = 0 : i64, scratch_operands = 0 : i64, tpu.core_type = #tpu.core_type<tc>} {
    %c0 = arith.constant 0 : index
    %c0_0 = arith.constant 0 : index
    %0 = vector.load %arg0[%c0, %c0_0] : memref<8x1024xbf16, #tpu.memory_space<vmem>>, vector<8x1024xbf16>
    %c0_1 = arith.constant 0 : index
    %c0_2 = arith.constant 0 : index
    %1 = vector.load %arg1[%c0_1, %c0_2] : memref<1024x128xbf16, #tpu.memory_space<vmem>>, vector<1024x128xbf16>
    %cst = arith.constant dense<0.000000e+00> : vector<8x128xf32>
    %2 = tpu.matmul %0, %1, %cst {dimension_numbers = #tpu.dot_dimension_numbers<[1], [0], [0], [1], [0, 0, 1, 1], [], []>} : vector<8x1024xbf16>, vector<1024x128xbf16>, vector<8x128xf32> -> vector<8x128xf32>
    %c0_3 = arith.constant 0 : index
    %c0_4 = arith.constant 0 : index
    %3 = vector.load %arg2[%c0_3, %c0_4] : memref<1x128xf32, #tpu.memory_space<vmem>>, vector<1x128xf32>
    %4 = vector.broadcast %3 : vector<1x128xf32> to vector<8x128xf32>
    %5 = arith.addf %2, %4 : vector<8x128xf32>
    %cst_5 = arith.constant 0.000000e+00 : f32
    %6 = vector.broadcast %cst_5 : f32 to vector<8x128xf32>
    %7 = arith.maximumf %5, %6 : vector<8x128xf32>
    %cst_6 = arith.constant dense<0.000000e+00> : vector<128xf32>
    %8 = vector.multi_reduction <add>, %7, %cst_6 [0] : vector<8x128xf32> to vector<128xf32>
    %9 = vector.shape_cast %8 : vector<128xf32> to vector<1x128xf32>
    %cst_7 = arith.constant 8.000000e+00 : f32
    %10 = vector.broadcast %cst_7 : f32 to vector<1x128xf32>
    %11 = arith.divf %9, %10 : vector<1x128xf32>
    %12 = vector.broadcast %11 : vector<1x128xf32> to vector<8x128xf32>
    %13 = arith.subf %7, %12 : vector<8x128xf32>
    %14 = arith.mulf %13, %13 : vector<8x128xf32>
    %cst_8 = arith.constant dense<0.000000e+00> : vector<128xf32>
    %15 = vector.multi_reduction <add>, %14, %cst_8 [0] : vector<8x128xf32> to vector<128xf32>
    %16 = vector.shape_cast %15 : vector<128xf32> to vector<1x128xf32>
    %cst_9 = arith.constant 8.000000e+00 : f32
    %17 = vector.broadcast %cst_9 : f32 to vector<1x128xf32>
    %18 = arith.divf %16, %17 : vector<1x128xf32>
    %19 = vector.broadcast %11 : vector<1x128xf32> to vector<8x128xf32>
    %20 = arith.subf %7, %19 : vector<8x128xf32>
    %cst_10 = arith.constant 9.99999974E-6 : f32
    %21 = vector.broadcast %cst_10 : f32 to vector<1x128xf32>
    %22 = arith.addf %18, %21 : vector<1x128xf32>
    %23 = math.rsqrt %22 : vector<1x128xf32>
    %24 = vector.broadcast %23 : vector<1x128xf32> to vector<8x128xf32>
    %25 = arith.mulf %20, %24 : vector<8x128xf32>
    %c0_11 = arith.constant 0 : index
    %c0_12 = arith.constant 0 : index
    %26 = vector.load %arg3[%c0_11, %c0_12] : memref<128x128xf32, #tpu.memory_space<vmem>>, vector<128x128xf32>
    %cst_13 = arith.constant dense<0.000000e+00> : vector<8x128xf32>
    %27 = tpu.matmul %25, %26, %cst_13 {dimension_numbers = #tpu.dot_dimension_numbers<[1], [0], [0], [1], [0, 0, 1, 1], [], []>} : vector<8x128xf32>, vector<128x128xf32>, vector<8x128xf32> -> vector<8x128xf32>
    %c0_14 = arith.constant 0 : index
    %c0_15 = arith.constant 0 : index
    %28 = vector.load %arg4[%c0_14, %c0_15] : memref<1x128xf32, #tpu.memory_space<vmem>>, vector<1x128xf32>
    %29 = vector.broadcast %28 : vector<1x128xf32> to vector<8x128xf32>
    %30 = arith.addf %27, %29 : vector<8x128xf32>
    %cst_16 = arith.constant 0.000000e+00 : f32
    %31 = vector.broadcast %cst_16 : f32 to vector<8x128xf32>
    %32 = arith.maximumf %30, %31 : vector<8x128xf32>
    %cst_17 = arith.constant dense<0.000000e+00> : vector<128xf32>
    %33 = vector.multi_reduction <add>, %32, %cst_17 [0] : vector<8x128xf32> to vector<128xf32>
    %34 = vector.shape_cast %33 : vector<128xf32> to vector<1x128xf32>
    %cst_18 = arith.constant 8.000000e+00 : f32
    %35 = vector.broadcast %cst_18 : f32 to vector<1x128xf32>
    %36 = arith.divf %34, %35 : vector<1x128xf32>
    %37 = vector.broadcast %36 : vector<1x128xf32> to vector<8x128xf32>
    %38 = arith.subf %32, %37 : vector<8x128xf32>
    %39 = arith.mulf %38, %38 : vector<8x128xf32>
    %cst_19 = arith.constant dense<0.000000e+00> : vector<128xf32>
    %40 = vector.multi_reduction <add>, %39, %cst_19 [0] : vector<8x128xf32> to vector<128xf32>
    %41 = vector.shape_cast %40 : vector<128xf32> to vector<1x128xf32>
    %cst_20 = arith.constant 8.000000e+00 : f32
    %42 = vector.broadcast %cst_20 : f32 to vector<1x128xf32>
    %43 = arith.divf %41, %42 : vector<1x128xf32>
    %44 = vector.broadcast %36 : vector<1x128xf32> to vector<8x128xf32>
    %45 = arith.subf %32, %44 : vector<8x128xf32>
    %cst_21 = arith.constant 9.99999974E-6 : f32
    %46 = vector.broadcast %cst_21 : f32 to vector<1x128xf32>
    %47 = arith.addf %43, %46 : vector<1x128xf32>
    %48 = math.rsqrt %47 : vector<1x128xf32>
    %49 = vector.broadcast %48 : vector<1x128xf32> to vector<8x128xf32>
    %50 = arith.mulf %45, %49 : vector<8x128xf32>
    %c0_22 = arith.constant 0 : index
    %c0_23 = arith.constant 0 : index
    %51 = vector.load %arg5[%c0_22, %c0_23] : memref<128x128xf32, #tpu.memory_space<vmem>>, vector<128x128xf32>
    %cst_24 = arith.constant dense<0.000000e+00> : vector<8x128xf32>
    %52 = tpu.matmul %50, %51, %cst_24 {dimension_numbers = #tpu.dot_dimension_numbers<[1], [0], [0], [1], [0, 0, 1, 1], [], []>} : vector<8x128xf32>, vector<128x128xf32>, vector<8x128xf32> -> vector<8x128xf32>
    %c0_25 = arith.constant 0 : index
    %c0_26 = arith.constant 0 : index
    %53 = vector.load %arg6[%c0_25, %c0_26] : memref<1x128xf32, #tpu.memory_space<vmem>>, vector<1x128xf32>
    %54 = vector.broadcast %53 : vector<1x128xf32> to vector<8x128xf32>
    %55 = arith.addf %52, %54 : vector<8x128xf32>
    %cst_27 = arith.constant dense<0xFF800000> : vector<8xf32>
    %56 = vector.multi_reduction <maximumf>, %55, %cst_27 [1] : vector<8x128xf32> to vector<8xf32>
    %57 = vector.shape_cast %56 : vector<8xf32> to vector<8x1xf32>
    %58 = vector.broadcast %57 : vector<8x1xf32> to vector<8x128xf32>
    %59 = arith.subf %55, %58 : vector<8x128xf32>
    %60 = math.exp %59 : vector<8x128xf32>
    %cst_28 = arith.constant dense<0.000000e+00> : vector<8xf32>
    %61 = vector.multi_reduction <add>, %60, %cst_28 [1] : vector<8x128xf32> to vector<8xf32>
    %62 = vector.shape_cast %61 : vector<8xf32> to vector<8x1xf32>
    %63 = math.log %62 : vector<8x1xf32>
    %64 = vector.broadcast %63 : vector<8x1xf32> to vector<8x128xf32>
    %65 = arith.subf %59, %64 : vector<8x128xf32>
    %c0_29 = arith.constant 0 : index
    %c0_30 = arith.constant 0 : index
    %66 = vector.load %arg7[%c0_29, %c0_30] : memref<8x128xf32, #tpu.memory_space<vmem>>, vector<8x128xf32>
    tpu.vector_store %arg7[%c0_29, %c0_30], %65 {strides = array<i32>} : memref<8x128xf32, #tpu.memory_space<vmem>>, vector<8x128xf32>,
    return
  }
}

</mosaic_0001>

<bundles_post_ra>
// kernel: tpu_custom_call.1
= control target key start
LH: loop header
LB: loop body
LE: loop exit
PB: predicated region body
PF: predicated region fallthrough
CT: control target
= control target key end

     0   :  { %12 = vsyncpa [#allocation3], 0  ;;  %s1709_s0 = inlined_call_operand.hbm [shape: bf16[8,1024], index: 0, kind: input, shape index: {}]   ;;  %s1710_s1 = inlined_call_operand.hbm [shape: bf16[1024,128], index: 1, kind: input, shape index: {}]   ;;  %s1711_s2 = inlined_call_operand.vmem [shape: f32[1,128], index: 2, kind: input, shape index: {}]   ;;  %s1712_s3 = inlined_call_operand.hbm [shape: f32[128,128], index: 3, kind: input, shape index: {}]   ;;  %s1713_s4 = inlined_call_operand.vmem [shape: f32[1,128], index: 4, kind: input, shape index: {}]   ;;  %s1714_s5 = inlined_call_operand.hbm [shape: f32[128,128], index: 5, kind: input, shape index: {}]   ;;  %s1715_s6 = inlined_call_operand.vmem [shape: f32[1,128], index: 6, kind: input, shape index: {}]   ;;  %s1716_s7 = inlined_call_operand.hbm [shape: f32[8,128], index: 7, kind: output, shape index: {}]  }
   0x1   :  { %13 = vsyncpa [#allocation6], 0 }
   0x2   :  { %14 = vsyncpa [#allocation9], 0 }
   0x3   :  { %15 = vsyncpa [#allocation4], 0  ;;  %s1572_s24 = smov [#allocation5]   ;;  %s1454_s28 = scalar_lea.hbm %s1710_s1, 8192 }
   0x4   :  { %s31_s25 = sshll.u32 %s1572_s24, 4  ;;  %p1455_p0 = scmp.ne.s32.totalorder %s1710_s1, %s1454_s28  ;;  %s32_s25 = int_to_ptr.vmem [resolvable:$true] %s31_s25 }
   0x5   :  { %p1458_p1 = scmp.lt.u32.totalorder %s1454_s28, %s1710_s1 }
   0x7   :  { %p1460_p2 = pnand %p1458_p1, %p1455_p0 }
   0x9   :  { %1463 = shalt.err (!%p1460_p2)
}
   0xa   :  { %s1464_s10 = scalar_lea.vmem %s32_s25, 8192  ;;  %p1469_p4 = scmp.lt.s32.totalorder %s32_s25, %s32_s25 }
   0xb   :  { %p1465_p3 = scmp.ne.s32.totalorder %s32_s25, %s1464_s10  ;;  %p1470_p5 = scmp.lt.s32.totalorder %s1464_s10, %s1464_s10 }
   0xd   :  { %p1471_p6 = por %p1470_p5, %p1469_p4 }
   0xf   :  { %p1472_p7 = pnand %p1471_p6, %p1465_p3 }
  0x11   :  { %1475 = shalt.err (!%p1472_p7)
}
  0x12   :  { %s1573_s11 = smov 64   ;;  %s1574_s12 = smov 4  }
  0x13   :  { %37 = dma.hbm_to_vmem [thread:$0]  %s1710_s1, 8192, %s32_s25, [#allocation6], %s1573_s11, %s1573_s11, %s1574_s12  }
  0x14   :  { %s1575_s15 = smov [#allocation2]   ;;  %s1576_s17 = smov [#allocation7]  }
  0x15   :  { %s22_s16 = sshll.u32 %s1575_s15, 4  ;;  %s45_s18 = sshll.u32 %s1576_s17, 4  ;;  %s23_s16 = int_to_ptr.vmem [resolvable:$true] %s22_s16  ;;  %s46_s18 = int_to_ptr.vmem [resolvable:$true] %s45_s18 }
  0x16   :  { %s1476_s21 = scalar_lea.hbm %s1709_s0, 512 }
  0x17   :  { %p1477_p8 = scmp.ne.s32.totalorder %s1709_s0, %s1476_s21  ;;  %p1480_p9 = scmp.lt.u32.totalorder %s1476_s21, %s1709_s0 }
  0x19   :  { %p1482_p10 = pnand %p1480_p9, %p1477_p8 }
  0x1b   :  { %1485 = shalt.err (!%p1482_p10)
}
  0x1c   :  { %s1486_s1 = scalar_lea.vmem %s23_s16, 512  ;;  %p1491_p12 = scmp.lt.s32.totalorder %s23_s16, %s23_s16 }
  0x1d   :  { %p1487_p11 = scmp.ne.s32.totalorder %s23_s16, %s1486_s1  ;;  %p1492_p13 = scmp.lt.s32.totalorder %s1486_s1, %s1486_s1 }
  0x1f   :  { %p1493_p0 = por %p1492_p13, %p1491_p12 }
  0x21   :  { %p1494_p1 = pnand %p1493_p0, %p1487_p11 }
  0x23   :  { %1497 = shalt.err (!%p1494_p1)
}
  0x24   :  { %25 = dma.hbm_to_vmem [thread:$0]  %s1709_s0, 512, %s23_s16, [#allocation3]  }
  0x25   :  { %s1498_s30 = scalar_lea.hbm %s1712_s3, 2048 }
  0x26   :  { %p1499_p2 = scmp.ne.s32.totalorder %s1712_s3, %s1498_s30  ;;  %p1502_p3 = scmp.lt.u32.totalorder %s1498_s30, %s1712_s3 }
  0x28   :  { %p1504_p4 = pnand %p1502_p3, %p1499_p2 }
  0x2a   :  { %1507 = shalt.err (!%p1504_p4)
}
  0x2b   :  { %s1508_s12 = scalar_lea.vmem %s46_s18, 2048  ;;  %p1513_p6 = scmp.lt.s32.totalorder %s46_s18, %s46_s18 }
  0x2c   :  { %p1509_p5 = scmp.ne.s32.totalorder %s46_s18, %s1508_s12  ;;  %p1514_p7 = scmp.lt.s32.totalorder %s1508_s12, %s1508_s12 }
  0x2e   :  { %p1515_p8 = por %p1514_p7, %p1513_p6 }
  0x30   :  { %p1516_p9 = pnand %p1515_p8, %p1509_p5 }
  0x32   :  { %1519 = shalt.err (!%p1516_p9)
}
  0x33   :  { %s1577_s0 = smov 128   ;;  %s1578_s13 = smov 8  }
  0x34   :  { %51 = dma.hbm_to_vmem [thread:$0]  %s1712_s3, 2048, %s46_s18, [#allocation6], %s1577_s0, %s1577_s0, %s1578_s13  }
  0x35   :  { %s1579_s16 = smov [#allocation8]   ;;  %s1520_s21 = scalar_lea.hbm %s1714_s5, 2048 }
  0x36   :  { %s59_s17 = sshll.u32 %s1579_s16, 4  ;;  %p1521_p10 = scmp.ne.s32.totalorder %s1714_s5, %s1520_s21  ;;  %s60_s17 = int_to_ptr.vmem [resolvable:$true] %s59_s17 }
  0x37   :  { %p1524_p11 = scmp.lt.u32.totalorder %s1520_s21, %s1714_s5 }
  0x39   :  { %p1526_p12 = pnand %p1524_p11, %p1521_p10 }
  0x3b   :  { %1529 = shalt.err (!%p1526_p12)
}
  0x3c   :  { %s1530_s1 = scalar_lea.vmem %s60_s17, 2048  ;;  %p1535_p0 = scmp.lt.s32.totalorder %s60_s17, %s60_s17 }
  0x3d   :  { %p1531_p13 = scmp.ne.s32.totalorder %s60_s17, %s1530_s1  ;;  %p1536_p1 = scmp.lt.s32.totalorder %s1530_s1, %s1530_s1 }
  0x3f   :  { %p1537_p2 = por %p1536_p1, %p1535_p0 }
  0x41   :  { %p1538_p3 = pnand %p1537_p2, %p1531_p13 }
  0x43   :  { %1541 = shalt.err (!%p1538_p3)
}
  0x44   :  { %65 = dma.hbm_to_vmem [thread:$0]  %s1714_s5, 2048, %s60_s17, [#allocation9], %s1577_s0, %s1577_s0, %s1578_s13  }
  0x45   :  { %1564 = dma.done.wait [#allocation3], 512  }
  0x46   :  { %1565 = vsyncadd [#allocation3], 4294966784 }
  0x47   :  { %1566 = dma.done.wait [#allocation6], 10240  }
  0x48   :  { %1567 = vsyncadd [#allocation6], 4294957056 }
  0x49   :  { %1568 = dma.done.wait [#allocation9], 2048  }
  0x4a   :  { %1569 = vsyncadd [#allocation9], 4294965248  ;;  %v1374_v0 = vld [vmem:[#allocation5 + $0x40] sm:$0xff]   ;;  %v1378_v4 = vld [vmem:[#allocation5 + $0x48] sm:$0xff]   ;;  %vm1581_vm0 = vmmov 0   ;;  %s1583_s29 = smov [#allocation10]  }
  0x4b   :  { %v1375_v1 = vld [vmem:[#allocation5 + $0xc0] sm:$0xff]   ;;  %1122 = vmatprep.subr.bf16.mxu0 %v1374_v0  ;;  %v1379_v5 = vld [vmem:[#allocation5 + $0xc8] sm:$0xff]   ;;  %v1382_v8 = vld [vmem:[#allocation5 + $0x50] sm:$0xff]   ;;  %s1036_s30 = sshll.u32 %s1583_s29, 4  ;;  %s1037_s30 = int_to_ptr.vmem [resolvable:$true] %s1036_s30 }
  0x4c   :  { %v1376_v2 = vld [vmem:[#allocation5] sm:$0xff]   ;;  %1144 = vmatprep.subr.bf16.mxu1 %v1375_v1  ;;  %v1380_v6 = vld [vmem:[#allocation5 + $0x8] sm:$0xff]   ;;  %v1383_v9 = vld [vmem:[#allocation5 + $0xd0] sm:$0xff]   ;;  %p1547_p5 = scmp.lt.s32.totalorder %s1037_s30, %s1037_s30 }
  0x4d   :  { %v1377_v3 = vld [vmem:[#allocation5 + $0x80] sm:$0xff]   ;;  %1123 = vmatpush3.bf16.msra.mxu0 %v1376_v2  ;;  %v1381_v7 = vld [vmem:[#allocation5 + $0x88] sm:$0xff]   ;;  %v1384_v10 = vld [vmem:[#allocation5 + $0x10] sm:$0xff]  }
  0x4e   :  { %1145 = vmatpush3.bf16.msra.mxu1 %v1377_v3  ;;  %1124 = vmatprep.subr.bf16.mxu0 %v1378_v4  ;;  %v1385_v11 = vld [vmem:[#allocation5 + $0x90] sm:$0xff]   ;;  %v1386_v12 = vld [vmem:[#allocation5 + $0x58] sm:$0xff]   ;;  %v1390_v16 = vld [vmem:[#allocation5 + $0x60] sm:$0xff]  }
  0x4f   :  { %1146 = vmatprep.subr.bf16.mxu1 %v1379_v5  ;;  %v1387_v13 = vld [vmem:[#allocation5 + $0xd8] sm:$0xff]   ;;  %v1391_v17 = vld [vmem:[#allocation5 + $0xe0] sm:$0xff]   ;;  %v1394_v20 = vld [vmem:[#allocation5 + $0x68] sm:$0xff]  }
  0x50   :  { %v1388_v14 = vld [vmem:[#allocation5 + $0x18] sm:$0xff]   ;;  %v1392_v18 = vld [vmem:[#allocation5 + $0x20] sm:$0xff]   ;;  %v1395_v21 = vld [vmem:[#allocation5 + $0xe8] sm:$0xff]  }
  0x51   :  { %1125 = vmatpush3.bf16.msra.mxu0 %v1380_v6  ;;  %v1389_v15 = vld [vmem:[#allocation5 + $0x98] sm:$0xff]   ;;  %v1393_v19 = vld [vmem:[#allocation5 + $0xa0] sm:$0xff]   ;;  %v1396_v22 = vld [vmem:[#allocation5 + $0x28] sm:$0xff]  }
  0x52   :  { %1147 = vmatpush3.bf16.msra.mxu1 %v1381_v7  ;;  %1126 = vmatprep.subr.bf16.mxu0 %v1382_v8  ;;  %v1397_v23 = vld [vmem:[#allocation5 + $0xa8] sm:$0xff]   ;;  %v1398_v24 = vld [vmem:[#allocation5 + $0x70] sm:$0xff]   ;;  %v1402_v28 = vld [vmem:[#allocation5 + $0x78] sm:$0xff]  }
  0x53   :  { %1148 = vmatprep.subr.bf16.mxu1 %v1383_v9  ;;  %v1399_v25 = vld [vmem:[#allocation5 + $0xf0] sm:$0xff]   ;;  %v1403_v29 = vld [vmem:[#allocation5 + $0xf8] sm:$0xff]   ;;  %v81_v32 = vld [vmem:[#allocation2] sm:$0xff] }
  0x54   :  { %v1400_v26 = vld [vmem:[#allocation5 + $0x30] sm:$0xff]   ;;  %v1404_v30 = vld [vmem:[#allocation5 + $0x38] sm:$0xff]   ;;  %v82_v33 = vld [vmem:[#allocation2 + $0x8] sm:$0xff]  ;;  %v1048_v34 = vcombine.low %v81_v32, %v81_v32  ;;  %v1049_v35 = vcombine.high %v81_v32, %v81_v32 }
  0x55   :  { %1127 = vmatpush3.bf16.msra.mxu0 %v1384_v10  ;;  %v1401_v27 = vld [vmem:[#allocation5 + $0xb0] sm:$0xff]   ;;  %v1405_v31 = vld [vmem:[#allocation5 + $0xb8] sm:$0xff]   ;;  %v1050_v36 = vcombine.low %v82_v33, %v82_v33  ;;  %v1051_v37 = vcombine.high %v82_v33, %v82_v33  ;;  %v1410_v38 = vld [vmem:[#allocation5 + $0x140] sm:$0xff]   ;;  %v1582_v33 = vmov 0.0  }
  0x56   :  { %1149 = vmatpush3.bf16.msra.mxu1 %v1385_v11  ;;  %1128 = vmatprep.subr.bf16.mxu0 %v1386_v12  ;;  %v1411_v39 = vld [vmem:[#allocation5 + $0x1c0] sm:$0xff]   ;;  %v1414_v42 = vld [vmem:[#allocation5 + $0x148] sm:$0xff]   ;;  %v1418_v46 = vld [vmem:[#allocation5 + $0x150] sm:$0xff]  }
  0x57   :  { %1150 = vmatprep.subr.bf16.mxu1 %v1387_v13  ;;  %664 = vmatprep.mubr.bf16.mxu0 %v1049_v35  ;;  %v1412_v40 = vld [vmem:[#allocation5 + $0x100] sm:$0xff]   ;;  %v1415_v43 = vld [vmem:[#allocation5 + $0x1c8] sm:$0xff]   ;;  %v1419_v47 = vld [vmem:[#allocation5 + $0x1d0] sm:$0xff]  }
  0x58   :  { %704 = vmatprep.mubr.bf16.mxu1 %v1051_v37  ;;  %v1413_v41 = vld [vmem:[#allocation5 + $0x180] sm:$0xff]   ;;  %v1416_v44 = vld [vmem:[#allocation5 + $0x108] sm:$0xff]   ;;  %v1420_v48 = vld [vmem:[#allocation5 + $0x110] sm:$0xff]  }
  0x59   :  { %1129 = vmatpush3.bf16.msra.mxu0 %v1388_v14  ;;  %v1417_v45 = vld [vmem:[#allocation5 + $0x188] sm:$0xff]   ;;  %v1421_v49 = vld [vmem:[#allocation5 + $0x190] sm:$0xff]   ;;  %v1422_v50 = vld [vmem:[#allocation5 + $0x158] sm:$0xff]  }
  0x5a   :  { %1151 = vmatpush3.bf16.msra.mxu1 %v1389_v15  ;;  %1130 = vmatprep.subr.bf16.mxu0 %v1390_v16  ;;  %v1423_v51 = vld [vmem:[#allocation5 + $0x1d8] sm:$0xff]   ;;  %v1426_v54 = vld [vmem:[#allocation5 + $0x160] sm:$0xff]   ;;  %v1430_v58 = vld [vmem:[#allocation5 + $0x168] sm:$0xff]   ;;  %v1580_v15 = vmov 0.0|0.0  }
  0x5b   :  { %1152 = vmatprep.subr.bf16.mxu1 %v1391_v17  ;;  %v1424_v52 = vld [vmem:[#allocation5 + $0x118] sm:$0xff]   ;;  %v1427_v55 = vld [vmem:[#allocation5 + $0x1e0] sm:$0xff]   ;;  %v1431_v59 = vld [vmem:[#allocation5 + $0x1e8] sm:$0xff]  }
  0x5c   :  { %v1425_v53 = vld [vmem:[#allocation5 + $0x198] sm:$0xff]   ;;  %v1428_v56 = vld [vmem:[#allocation5 + $0x120] sm:$0xff]   ;;  %v1432_v60 = vld [vmem:[#allocation5 + $0x128] sm:$0xff]  }
  0x5d   :  { %1131 = vmatpush3.bf16.msra.mxu0 %v1392_v18  ;;  %v1429_v57 = vld [vmem:[#allocation5 + $0x1a0] sm:$0xff]   ;;  %v1433_v61 = vld [vmem:[#allocation5 + $0x1a8] sm:$0xff]   ;;  %v1434_v62 = vld [vmem:[#allocation5 + $0x170] sm:$0xff]  }
  0x5e   :  { %1153 = vmatpush3.bf16.msra.mxu1 %v1393_v19  ;;  %1132 = vmatprep.subr.bf16.mxu0 %v1394_v20  ;;  %v1435_v63 = vld [vmem:[#allocation5 + $0x1f0] sm:$0xff]   ;;  %v1438_v2 = vld [vmem:[#allocation5 + $0x178] sm:$0xff]   ;;  %v813_v12 = vld [vmem:[#allocation7] sm:$0xff] }
  0x5f   :  { %1154 = vmatprep.subr.bf16.mxu1 %v1395_v21  ;;  %v1436_v0 = vld [vmem:[#allocation5 + $0x130] sm:$0xff]   ;;  %v1439_v3 = vld [vmem:[#allocation5 + $0x1f8] sm:$0xff]   ;;  %v814_v13 = vld [vmem:[#allocation7 + $0x8] sm:$0xff] }
  0x60   :  { %v1437_v1 = vld [vmem:[#allocation5 + $0x1b0] sm:$0xff]   ;;  %v1440_v4 = vld [vmem:[#allocation5 + $0x138] sm:$0xff]   ;;  %v1315_v14 = vpack.c.bf16 %v814_v13, %v813_v12  ;;  %v817_v19 = vld [vmem:[#allocation7 + $0x20] sm:$0xff] }
  0x61   :  { %1133 = vmatpush3.bf16.msra.mxu0 %v1396_v22  ;;  %v1441_v5 = vld [vmem:[#allocation5 + $0x1b8] sm:$0xff]   ;;  %v83_v6 = vld [vmem:[#allocation2 + $0x10] sm:$0xff]  ;;  %v818_v20 = vld [vmem:[#allocation7 + $0x28] sm:$0xff] }
  0x62   :  { %1155 = vmatpush3.bf16.msra.mxu1 %v1397_v23  ;;  %1134 = vmatprep.subr.bf16.mxu0 %v1398_v24  ;;  %v1052_v7 = vcombine.low %v83_v6, %v83_v6  ;;  %v1053_v8 = vcombine.high %v83_v6, %v83_v6  ;;  %v84_v9 = vld [vmem:[#allocation2 + $0x18] sm:$0xff]  ;;  %v815_v16 = vld [vmem:[#allocation7 + $0x10] sm:$0xff]  ;;  %v1321_v21 = vpack.c.bf16 %v818_v20, %v817_v19  ;;  %v826_v32 = vld [vmem:[#allocation7 + $0x68] sm:$0xff] }
  0x63   :  { %1156 = vmatprep.subr.bf16.mxu1 %v1399_v25  ;;  %v1054_v10 = vcombine.low %v84_v9, %v84_v9  ;;  %v1055_v11 = vcombine.high %v84_v9, %v84_v9  ;;  %v816_v17 = vld [vmem:[#allocation7 + $0x18] sm:$0xff]  ;;  %v819_v22 = vld [vmem:[#allocation7 + $0x30] sm:$0xff]  ;;  %v821_v25 = vld [vmem:[#allocation7 + $0x40] sm:$0xff] }
  0x64   :  { %v1318_v18 = vpack.c.bf16 %v816_v17, %v815_v16  ;;  %v820_v23 = vld [vmem:[#allocation7 + $0x38] sm:$0xff]  ;;  %v827_v35 = vld [vmem:[#allocation7 + $0x70] sm:$0xff]  ;;  %v926_v20 = vld [vmem:[#allocation8] sm:$0xff] }
  0x65   :  { %1135 = vmatpush3.bf16.msra.mxu0 %v1400_v26  ;;  %v1324_v24 = vpack.c.bf16 %v820_v23, %v819_v22  ;;  %v822_v26 = vld [vmem:[#allocation7 + $0x48] sm:$0xff]  ;;  %v928_v23 = vld [vmem:[#allocation8 + $0x10] sm:$0xff] }
  0x66   :  { %1157 = vmatpush3.bf16.msra.mxu1 %v1401_v27  ;;  %1136 = vmatprep.subr.bf16.mxu0 %v1402_v28  ;;  %v1327_v27 = vpack.c.bf16 %v822_v26, %v821_v25  ;;  %v823_v28 = vld [vmem:[#allocation7 + $0x50] sm:$0xff]  ;;  %v930_v26 = vld [vmem:[#allocation8 + $0x20] sm:$0xff] }
  0x67   :  { %1158 = vmatprep.subr.bf16.mxu1 %v1403_v29  ;;  %v824_v29 = vld [vmem:[#allocation7 + $0x58] sm:$0xff] }
  0x69   :  { %1137 = vmatpush3.bf16.msra.mxu0 %v1404_v30  ;;  %v1330_v30 = vpack.c.bf16 %v824_v29, %v823_v28  ;;  %v932_v29 = vld [vmem:[#allocation8 + $0x30] sm:$0xff] }
  0x6a   :  { %1159 = vmatpush3.bf16.msra.mxu1 %v1405_v31  ;;  %1166 = vmatprep.subr.bf16.mxu0 %v1410_v38  ;;  %v825_v31 = vld [vmem:[#allocation7 + $0x60] sm:$0xff] }
  0x6b   :  { %1188 = vmatprep.subr.bf16.mxu1 %v1411_v39 }
  0x6c   :  { %665 = vmatmul.mubr.bf16.vlgmr.msra.gmra.mrb[0].mxu0 %v1048_v34  ;;  %v1333_v34 = vpack.c.bf16 %v826_v32, %v825_v31  ;;  %v934_v32 = vld [vmem:[#allocation8 + $0x40] sm:$0xff] }
  0x6d   :  { %705 = vmatmul.mubr.bf16.vlgmr.msra.gmra.mrb[0].mxu1 %v1050_v36  ;;  %1167 = vmatpush3.bf16.msra.mxu0 %v1412_v40  ;;  %v828_v36 = vld [vmem:[#allocation7 + $0x78] sm:$0xff]  ;;  %v1047_v40 = vld [vmem:[%s1711_s2] ss:$0 sm:$0xff] }
  0x6e   :  { %1189 = vmatpush3.bf16.msra.mxu1 %v1413_v41  ;;  %1168 = vmatprep.subr.bf16.mxu0 %v1414_v42  ;;  %v1336_v37 = vpack.c.bf16 %v828_v36, %v827_v35  ;;  %v936_v35 = vld [vmem:[#allocation8 + $0x50] sm:$0xff]  ;;  %v937_v36 = vld [vmem:[#allocation8 + $0x58] sm:$0xff] }
  0x6f   :  { %1190 = vmatprep.subr.bf16.mxu1 %v1415_v43  ;;  %744 = vmatprep.mubr.bf16.mxu0 %v1053_v8 }
  0x70   :  { %784 = vmatprep.mubr.bf16.mxu1 %v1055_v11 }
  0x71   :  { %1169 = vmatpush3.bf16.msra.mxu0 %v1416_v44 }
  0x72   :  { %1191 = vmatpush3.bf16.msra.mxu1 %v1417_v45  ;;  %1170 = vmatprep.subr.bf16.mxu0 %v1418_v46 }
  0x73   :  { %1192 = vmatprep.subr.bf16.mxu1 %v1419_v47 }
  0x75   :  { %1171 = vmatpush3.bf16.msra.mxu0 %v1420_v48 }
  0x76   :  { %1193 = vmatpush3.bf16.msra.mxu1 %v1421_v49  ;;  %1172 = vmatprep.subr.bf16.mxu0 %v1422_v50 }
  0x77   :  { %1194 = vmatprep.subr.bf16.mxu1 %v1423_v51 }
  0x79   :  { %1173 = vmatpush3.bf16.msra.mxu0 %v1424_v52 }
  0x7a   :  { %1195 = vmatpush3.bf16.msra.mxu1 %v1425_v53  ;;  %1174 = vmatprep.subr.bf16.mxu0 %v1426_v54 }
  0x7b   :  { %1196 = vmatprep.subr.bf16.mxu1 %v1427_v55 }
  0x7d   :  { %1175 = vmatpush3.bf16.msra.mxu0 %v1428_v56 }
  0x7e   :  { %1197 = vmatpush3.bf16.msra.mxu1 %v1429_v57  ;;  %1176 = vmatprep.subr.bf16.mxu0 %v1430_v58 }
  0x7f   :  { %1198 = vmatprep.subr.bf16.mxu1 %v1431_v59 }
  0x81   :  { %1177 = vmatpush3.bf16.msra.mxu0 %v1432_v60 }
  0x82   :  { %1199 = vmatpush3.bf16.msra.mxu1 %v1433_v61  ;;  %1178 = vmatprep.subr.bf16.mxu0 %v1434_v62 }
  0x83   :  { %1200 = vmatprep.subr.bf16.mxu1 %v1435_v63 }
  0x85   :  { %1179 = vmatpush3.bf16.msra.mxu0 %v1436_v0 }
  0x86   :  { %1201 = vmatpush3.bf16.msra.mxu1 %v1437_v1  ;;  %1180 = vmatprep.subr.bf16.mxu0 %v1438_v2 }
  0x87   :  { %1202 = vmatprep.subr.bf16.mxu1 %v1439_v3 }
  0x89   :  { %1181 = vmatpush3.bf16.msra.mxu0 %v1440_v4 }
  0x8a   :  { %1203 = vmatpush3.bf16.msra.mxu1 %v1441_v5  ;;  %1314 = vmatprep.subr.bf16.mxu0 %v1580_v15 }
  0x8b   :  { %1338 = vmatprep.subr.bf16.mxu1 %v1580_v15 }
  0x8c   :  { %745 = vmatmul.mubr.bf16.vlgmr.msra.gmra.mrb[4].mxu0 %v1052_v7 }
  0x8d   :  { %785 = vmatmul.mubr.bf16.vlgmr.msra.gmra.mrb[4].mxu1 %v1054_v10  ;;  %1316 = vmatpush3.bf16.msra.mxu0 %v1315_v14 }
  0x8e   :  { %1317 = vmatprep.subr.bf16.mxu0 %v1580_v15  ;;  %1276 = vmatprep.mubr.msk.f32.mxu0 %vm1581_vm0, %v1582_v33 }
  0x8f   :  { %1311 = vmatprep.mubr.msk.f32.mxu1 %vm1581_vm0, %v1582_v33  ;;  %v935_v33 = vld [vmem:[#allocation8 + $0x48] sm:$0xff] }
  0x91   :  { %1319 = vmatpush3.bf16.msra.mxu0 %v1318_v18 }
  0x92   :  { %1320 = vmatprep.subr.bf16.mxu0 %v1580_v15 }
  0x95   :  { %1322 = vmatpush3.bf16.msra.mxu0 %v1321_v21  ;;  %v927_v21 = vld [vmem:[#allocation8 + $0x8] sm:$0xff] }
  0x96   :  { %1323 = vmatprep.subr.bf16.mxu0 %v1580_v15  ;;  %v1339_v22 = vpack.c.bf16 %v927_v21, %v926_v20 }
  0x98   :  { %1340 = vmatpush3.bf16.msra.mxu1 %v1339_v22 }
  0x99   :  { %1325 = vmatpush3.bf16.msra.mxu0 %v1324_v24  ;;  %1341 = vmatprep.subr.bf16.mxu1 %v1580_v15  ;;  %v929_v24 = vld [vmem:[#allocation8 + $0x18] sm:$0xff] }
  0x9a   :  { %1326 = vmatprep.subr.bf16.mxu0 %v1580_v15  ;;  %v1342_v25 = vpack.c.bf16 %v929_v24, %v928_v23 }
  0x9c   :  { %1343 = vmatpush3.bf16.msra.mxu1 %v1342_v25 }
  0x9d   :  { %1328 = vmatpush3.bf16.msra.mxu0 %v1327_v27  ;;  %1344 = vmatprep.subr.bf16.mxu1 %v1580_v15  ;;  %v931_v27 = vld [vmem:[#allocation8 + $0x28] sm:$0xff] }
  0x9e   :  { %1329 = vmatprep.subr.bf16.mxu0 %v1580_v15  ;;  %v1345_v28 = vpack.c.bf16 %v931_v27, %v930_v26 }
  0xa0   :  { %1346 = vmatpush3.bf16.msra.mxu1 %v1345_v28 }
  0xa1   :  { %1331 = vmatpush3.bf16.msra.mxu0 %v1330_v30  ;;  %1347 = vmatprep.subr.bf16.mxu1 %v1580_v15  ;;  %v933_v30 = vld [vmem:[#allocation8 + $0x38] sm:$0xff] }
  0xa2   :  { %1332 = vmatprep.subr.bf16.mxu0 %v1580_v15  ;;  %v1348_v31 = vpack.c.bf16 %v933_v30, %v932_v29 }
  0xa4   :  { %1349 = vmatpush3.bf16.msra.mxu1 %v1348_v31 }
  0xa5   :  { %1334 = vmatpush3.bf16.msra.mxu0 %v1333_v34  ;;  %1350 = vmatprep.subr.bf16.mxu1 %v1580_v15  ;;  %v1351_v34 = vpack.c.bf16 %v935_v33, %v934_v32 }
  0xa6   :  { %1335 = vmatprep.subr.bf16.mxu0 %v1580_v15 }
  0xa8   :  { %1352 = vmatpush3.bf16.msra.mxu1 %v1351_v34 }
  0xa9   :  { %1337 = vmatpush3.bf16.msra.mxu0 %v1336_v37  ;;  %1353 = vmatprep.subr.bf16.mxu1 %v1580_v15  ;;  %v1354_v37 = vpack.c.bf16 %v937_v36, %v936_v35 }
  0xac   :  { %1355 = vmatpush3.bf16.msra.mxu1 %v1354_v37 }
  0xad   :  { %1356 = vmatprep.subr.bf16.mxu1 %v1580_v15 }
 0x13f   :  { %v1138_v38 = vpop.f32.mrb[0].mxu0 }
 0x140   :  { %v1160_v39 = vpop.f32.mrb[0].mxu1  ;;  %v1139_v41 = vpop.f32.mrb[1].mxu0 }
 0x141   :  { %v1161_v42 = vpop.f32.mrb[1].mxu1  ;;  %v1140_v43 = vadd.f32 %v1139_v41, %v1138_v38  ;;  %v1141_v45 = vpop.f32.mrb[2].mxu0  ;;  %v938_v38 = vld [vmem:[#allocation8 + $0x60] sm:$0xff]  ;;  %v940_v41 = vld [vmem:[#allocation8 + $0x70] sm:$0xff] }
 0x142   :  { %v1162_v44 = vadd.f32 %v1161_v42, %v1160_v39  ;;  %v1163_v46 = vpop.f32.mrb[2].mxu1  ;;  %v1142_v47 = vpop.f32.mrb[3].mxu0  ;;  %v939_v39 = vld [vmem:[#allocation8 + $0x68] sm:$0xff]  ;;  %v941_v42 = vld [vmem:[#allocation8 + $0x78] sm:$0xff] }
 0x143   :  { %v1164_v48 = vpop.f32.mrb[3].mxu1  ;;  %v667_v49 = vadd.f32 %v1140_v43, %v1047_v40  ;;  %v1357_v40 = vpack.c.bf16 %v939_v39, %v938_v38  ;;  %v1360_v43 = vpack.c.bf16 %v941_v42, %v940_v41 }
 0x145   :  { %v707_v50 = vadd.f32 %v1162_v44, %v667_v49  ;;  %1358 = vmatpush3.bf16.msra.mxu1 %v1357_v40  ;;  %v1120_v44 = vld [vmem:[%s1713_s4] ss:$0 sm:$0xff] }
 0x146   :  { %1359 = vmatprep.subr.bf16.mxu1 %v1580_v15 }
 0x149   :  { %1361 = vmatpush3.bf16.msra.mxu1 %v1360_v43 }
 0x15f   :  { %v1182_v51 = vpop.f32.mrb[4].mxu0 }
 0x160   :  { %v1204_v52 = vpop.f32.mrb[4].mxu1  ;;  %v1183_v53 = vpop.f32.mrb[5].mxu0 }
 0x161   :  { %v1205_v54 = vpop.f32.mrb[5].mxu1  ;;  %v1184_v55 = vadd.f32 %v1183_v53, %v1182_v51  ;;  %v1185_v57 = vpop.f32.mrb[6].mxu0 }
 0x162   :  { %v1206_v56 = vadd.f32 %v1205_v54, %v1204_v52  ;;  %v1207_v58 = vpop.f32.mrb[6].mxu1  ;;  %v1186_v59 = vpop.f32.mrb[7].mxu0 }
 0x163   :  { %v1208_v60 = vpop.f32.mrb[7].mxu1  ;;  %v747_v61 = vadd.f32 %v1184_v55, %v707_v50 }
 0x165   :  { %v787_v62 = vadd.f32 %v1206_v56, %v747_v61 }
 0x167   :  { %v792_v63 = vmax.f32 %v787_v62, 0.0 }
 0x169   :  { %v793_v0 = vrot.slane %v792_v63, 4 }
 0x16b   :  { %v794_v1 = vadd.f32 %v793_v0, %v792_v63 }
 0x16d   :  { %v795_v2 = vrot.slane %v794_v1, 2 }
 0x16f   :  { %v796_v3 = vadd.f32 %v795_v2, %v794_v1 }
 0x171   :  { %v797_v4 = vrot.slane %v796_v3, 1 }
 0x173   :  { %v798_v5 = vadd.f32 %v797_v4, %v796_v3  ;;  %v1121_v3 = vld [vmem:[%s1715_s6] ss:$0 sm:$0xff]  ;;  %s1542_s6 = scalar_lea.vmem %s1037_s30, 128 }
 0x174   :  { %p1543_p4 = scmp.ne.s32.totalorder %s1037_s30, %s1542_s6  ;;  %p1548_p6 = scmp.lt.s32.totalorder %s1542_s6, %s1542_s6 }
 0x175   :  { %v800_v6 = vmul.f32 0.125, %v798_v5 }
 0x176   :  { %p1549_p7 = por %p1548_p6, %p1547_p5 }
 0x177   :  { %v801_v7 = vsub.f32 %v792_v63, %v800_v6 }
 0x178   :  { %p1550_p8 = pnand %p1549_p7, %p1543_p4 }
 0x179   :  { %v802_v8 = vmul.f32 %v801_v7, %v801_v7 }
 0x17b   :  { %v803_v9 = vrot.slane %v802_v8, 4 }
 0x17d   :  { %v804_v10 = vadd.f32 %v803_v9, %v802_v8 }
 0x17f   :  { %v805_v11 = vrot.slane %v804_v10, 2 }
 0x181   :  { %v806_v12 = vadd.f32 %v805_v11, %v804_v10 }
 0x183   :  { %v807_v13 = vrot.slane %v806_v12, 1 }
 0x185   :  { %v808_v14 = vadd.f32 %v807_v13, %v806_v12 }
 0x187   :  { %v809_v16 = vmul.f32 0.125, %v808_v14 }
 0x189   :  { %v810_v17 = vadd.f32 1e-05, %v809_v16 }
 0x18b   :  { %1446 = vrsqrt.f32 %v810_v17 }
 0x195   :  { %v1447_v18 = vpop.eup %1446 }
 0x196   :  { %v812_v19 = vmul.f32 %v1447_v18, %v801_v7 }
 0x198   :  { %1277 = vmatmul.mubr.f32.vlgmr.msra.gmra.mrb[8].mxu0 %v812_v19 }
 0x26b   :  { %v902_v45 = vpop.f32.mrb[8].mxu0 }
 0x26c   :  { %v903_v46 = vadd.f32 %v1120_v44, %v902_v45  ;;  %v1278_v47 = vpop.f32.mrb[9].mxu0 }
 0x26e   :  { %v906_v48 = vmax.f32 %v903_v46, 0.0 }
 0x270   :  { %v907_v49 = vrot.slane %v906_v48, 4 }
 0x272   :  { %v908_v50 = vadd.f32 %v907_v49, %v906_v48 }
 0x274   :  { %v909_v51 = vrot.slane %v908_v50, 2 }
 0x276   :  { %v910_v52 = vadd.f32 %v909_v51, %v908_v50 }
 0x278   :  { %v911_v53 = vrot.slane %v910_v52, 1 }
 0x27a   :  { %v912_v54 = vadd.f32 %v911_v53, %v910_v52 }
 0x27c   :  { %v913_v55 = vmul.f32 0.125, %v912_v54 }
 0x27e   :  { %v914_v56 = vsub.f32 %v906_v48, %v913_v55 }
 0x280   :  { %v915_v57 = vmul.f32 %v914_v56, %v914_v56 }
 0x282   :  { %v916_v58 = vrot.slane %v915_v57, 4 }
 0x284   :  { %v917_v15 = vadd.f32 %v916_v58, %v915_v57 }
 0x286   :  { %v918_v59 = vrot.slane %v917_v15, 2 }
 0x288   :  { %v919_v60 = vadd.f32 %v918_v59, %v917_v15 }
 0x28a   :  { %v920_v61 = vrot.slane %v919_v60, 1 }
 0x28c   :  { %v921_v62 = vadd.f32 %v920_v61, %v919_v60 }
 0x28e   :  { %v922_v63 = vmul.f32 0.125, %v921_v62 }
 0x290   :  { %v923_v0 = vadd.f32 1e-05, %v922_v63 }
 0x292   :  { %1448 = vrsqrt.f32 %v923_v0 }
 0x29c   :  { %v1449_v1 = vpop.eup %1448 }
 0x29d   :  { %v925_v2 = vmul.f32 %v1449_v1, %v914_v56 }
 0x29f   :  { %1312 = vmatmul.mubr.f32.vlgmr.msra.gmra.mrb[8].mxu1 %v925_v2 }
 0x372   :  { %v1015_v4 = vpop.f32.mrb[8].mxu1 }
 0x373   :  { %v1016_v5 = vadd.f32 %v1121_v3, %v1015_v4  ;;  %v1313_v6 = vpop.f32.mrb[9].mxu1 }
 0x375   :  { %1019 = vmax.xlane.f32.xlu0 %v1016_v5 }
 0x402   :  { %v1020_v7 = vpop.xlane.xlu0 %1019 }
 0x403   :  { %v1021_v8 = vsub.f32 %v1016_v5, %v1020_v7 }
 0x405   :  { %v1022_v9 = vmul.f32 1.442695, %v1021_v8 }
 0x407   :  { %1450 = vpow2.f32 %v1022_v9 }
 0x411   :  { %v1451_v10 = vpop.eup %1450 }
 0x412   :  { %1024 = vadd.xlane.f32.xlu0 %v1451_v10 }
 0x49f   :  { %v1025_v11 = vpop.xlane.xlu0 %1024 }
 0x4a0   :  { %1452 = vlog2.f32 %v1025_v11 }
 0x4aa   :  { %v1453_v12 = vpop.eup %1452 }
 0x4ab   :  { %v1027_v13 = vmul.f32 0.6931472, %v1453_v12 }
 0x4ad   :  { %v1028_v14 = vsub.f32 %v1021_v8, %v1027_v13 }
 0x4af   :  { %1029 = vst [vmem:[#allocation10] sm:$0xff] %v1028_v14 }
 0x4b0   :  { %1553 = shalt.err (!%p1550_p8)
}
 0x4b1   :  { %s1554_s10 = scalar_lea.hbm %s1716_s7, 128 }
 0x4b2   :  { %p1555_p9 = scmp.ne.s32.totalorder %s1716_s7, %s1554_s10  ;;  %p1558_p10 = scmp.lt.u32.totalorder %s1554_s10, %s1716_s7 }
 0x4b4   :  { %p1560_p11 = pnand %p1558_p10, %p1555_p9 }
 0x4b6   :  { %1563 = shalt.err (!%p1560_p11)
}
 0x4b7   :  { %1039 = dma.vmem_to_hbm [thread:$0]  %s1037_s30, 128, %s1716_s7, [#allocation4]  }
 0x4b8   :  { %1570 = dma.done.wait [#allocation4], 128  }
 0x4b9   :  { %1571 = vsyncadd [#allocation4], 4294967168 }
 0x4ba   :  { %1043 = vsyncpa [#allocation3], 1 }
 0x4bb   :  { %1044 = vsyncpa [#allocation6], 1 }
 0x4bc   :  { %1045 = vsyncpa [#allocation9], 1 }
 0x4bd   :  { %1046 = vsyncpa [#allocation4], 1 }

</bundles_post_ra>
